<compile_context>
chip_gen: v7x
topology: tpu7x:2x2x1
jax: 0.10.0
libtpu: 0.0.40
codegen_flags: <defaults>
</compile_context>

<pallas_src>
import functools
import math

import jax
import jax.numpy as jnp
from jax.experimental import pallas as pl
from jax.experimental.pallas import tpu as pltpu

_LOG_2PI = math.log(2.0 * math.pi)


def _round_up(x: int, m: int) -> int:
    return (x + m - 1) // m * m


def _pick_block_b(batch: int, num_vars: int, x_itemsize: int) -> int:
    # Keep the double-buffered x window (2 * TB * V * itemsize) <= ~8 MiB so the
    # pipeline fits v5e's 16 MiB default scoped-VMEM budget even without the
    # explicit limit bump (v6e/v7x defaults are 32 MiB); resident weights/bias
    # are tiny by comparison.
    budget = 8 * 1024 * 1024
    tb = budget // (2 * num_vars * x_itemsize)
    tb = min(tb, 4096)                          # raised cap (was 512): amortize ~0.35us/step
    tb = min(tb, _round_up(batch, 8))           # never (much) exceed the batch
    # v7x megacore: aim for >= 4 "parallel" grid steps once that still leaves
    # >= 512-row tiles, so the batch axis shards across both TensorCores.
    tb = min(tb, max(512, _round_up(pl.cdiv(batch, 4), 8)))
    return max(8, (tb // 8) * 8)


def _pc_log_score_kernel(x_ref, wa_ref, wb_ref, bias_ref, out_ref, *, matmul_dtype):
    # x tile: (TB, V) in the streamed dtype; upcast to f32 before squaring.
    x = x_ref[...].astype(jnp.float32)
    xx = x * x                                                   # VPU, f32

    # Two accumulated MXU dots (no lane-axis concat copy); operands cast right
    # before the dot, accumulation stays f32.
    scores = jnp.dot(xx.astype(matmul_dtype), wa_ref[...],
                     preferred_element_type=jnp.float32)         # (TB, Kp)
    scores = scores + jnp.dot(x.astype(matmul_dtype), wb_ref[...],
                              preferred_element_type=jnp.float32)
    scores = scores + bias_ref[...]                              # + (c_k + log w_k)

    # Mixture (sum layer): numerically stable logsumexp over components.
    m = jnp.max(scores, axis=-1, keepdims=True)                  # (TB, 1)
    z = jnp.sum(jnp.exp(scores - m), axis=-1, keepdims=True)     # (TB, 1)
    out_ref[...] = m + jnp.log(z)                                # masked on the ragged edge


def pc_log_score(x, mu, log_sigma, logits, *, block_b=None,
                 matmul_dtype=jnp.bfloat16, stream_dtype=jnp.float32):
    """x: (B, V); mu, log_sigma: (K, V); logits: (K,).  Returns (B, 1) f32.

    matmul_dtype: MXU operand dtype (bf16 production path; f32 for validation).
    stream_dtype: dtype x is streamed from HBM in (bf16 halves HBM traffic on
                  v6e/v7x at a small precision cost; f32 by default).
    """
    B, V = x.shape
    K, _ = mu.shape

    mu = mu.astype(jnp.float32)
    log_sigma = log_sigma.astype(jnp.float32)

    inv_var = jnp.exp(-2.0 * log_sigma)                        # 1 / sigma^2
    a = -0.5 * inv_var                                         # (K, V)
    b = mu * inv_var                                           # (K, V)
    bias = (jnp.sum(-0.5 * mu * mu * inv_var - log_sigma - 0.5 * _LOG_2PI, axis=-1)
            + jax.nn.log_softmax(logits.astype(jnp.float32)))  # (K,)  = c + log_w

    # Pad only the (tiny, VMEM-resident) component axis to a lane-dense multiple
    # of 128.  Padded components get a large negative *finite* bias so they
    # contribute exp(-huge) == 0 to the logsumexp without producing NaNs.
    Kp = _round_up(K, 128)
    wa = jnp.pad(a, ((0, Kp - K), (0, 0))).T.astype(matmul_dtype)   # (V, Kp)
    wb = jnp.pad(b, ((0, Kp - K), (0, 0))).T.astype(matmul_dtype)   # (V, Kp)
    bias = jnp.pad(bias, (0, Kp - K), constant_values=-1e30)
    bias = bias.reshape(1, Kp).astype(jnp.float32)

    # The streamed operand: NO wrapper-side padding (neither batch nor V axis).
    x = x.astype(stream_dtype)
    itemsize = jnp.dtype(stream_dtype).itemsize

    if block_b is None:
        block_b = _pick_block_b(B, V, itemsize)
    nb = pl.cdiv(B, block_b)   # ragged last block handled by Pallas edge masking

    out = pl.pallas_call(
        functools.partial(_pc_log_score_kernel, matmul_dtype=matmul_dtype),
        out_shape=jax.ShapeDtypeStruct((B, 1), jnp.float32),
        grid=(nb,),
        in_specs=[
            pl.BlockSpec((block_b, V), lambda i: (i, 0)),   # streamed x tile
            pl.BlockSpec((V, Kp), lambda i: (0, 0)),        # resident A  (x*x weights)
            pl.BlockSpec((V, Kp), lambda i: (0, 0)),        # resident Bw (x weights)
            pl.BlockSpec((1, Kp), lambda i: (0, 0)),        # resident bias (c + log w)
        ],
        out_specs=pl.BlockSpec((block_b, 1), lambda i: (i, 0)),
        compiler_params=pltpu.CompilerParams(
            dimension_semantics=("parallel",),
            vmem_limit_bytes=32 * 1024 * 1024),
    )(x, wa, wb, bias)
    return out


def pc_log_score_ref(x, mu, log_sigma, logits):
    """Pure-JAX reference of the same PC forward (for sanity checking)."""
    sigma = jnp.exp(log_sigma)
    log_w = jax.nn.log_softmax(logits)                         # (K,)
    diff = x[:, None, :] - mu[None, :, :]
    logp = (-0.5 * (diff / sigma[None]) ** 2 - log_sigma[None] - 0.5 * _LOG_2PI)
    comp = jnp.sum(logp, axis=-1) + log_w[None, :]             # (B, K)
    return jax.scipy.special.logsumexp(comp, axis=-1, keepdims=True)


if __name__ == "__main__":
    # Small, PC-consistent shapes: image_shape=(1, 8, 8) -> num_variables=64.
    B = 8          # batch
    C, H, W = 1, 8, 8
    V = C * H * W  # num_variables = 64 (no x padding needed at all)
    K = 16         # mixture components (sum-layer width)

    key = jax.random.PRNGKey(0)
    kx, kmu, ksig, kw = jax.random.split(key, 4)

    # Deterministic synthetic parameters (no checkpoint loading).
    x_img = jax.random.normal(kx, (B, C, H, W), dtype=jnp.float32)  # NCHW input
    x = x_img.reshape(B, V)                                          # glue: flatten
    mu = 0.5 * jax.random.normal(kmu, (K, V), dtype=jnp.float32)
    log_sigma = 0.1 * jax.random.normal(ksig, (K, V), dtype=jnp.float32)
    logits = jax.random.normal(kw, (K,), dtype=jnp.float32)

    ref = pc_log_score_ref(x, mu, log_sigma, logits)

    # f32 MXU path: tight tolerance vs. reference (validation only).
    out_f32 = jax.block_until_ready(
        pc_log_score(x, mu, log_sigma, logits, matmul_dtype=jnp.float32))
    assert out_f32.shape == (B, 1)
    assert jnp.allclose(out_f32, ref, atol=5e-3, rtol=1e-4), (out_f32, ref)

    # bf16 MXU path (production default on v5e/v6e/v7x): relaxed tolerance.
    out_bf16 = jax.block_until_ready(pc_log_score(x, mu, log_sigma, logits))
    assert out_bf16.shape == (B, 1)
    assert jnp.allclose(out_bf16, ref, atol=0.5, rtol=2e-2), (out_bf16, ref)

    # Multi-step grid with a ragged last batch block (B2 not a multiple of the
    # tile): exercises the un-padded streaming path + masked edge store.
    B2 = 300
    x2 = jax.random.normal(jax.random.PRNGKey(1), (B2, V), dtype=jnp.float32)
    ref2 = pc_log_score_ref(x2, mu, log_sigma, logits)
    out2 = jax.block_until_ready(
        pc_log_score(x2, mu, log_sigma, logits, block_b=128,
                     matmul_dtype=jnp.float32))
    assert out2.shape == (B2, 1)
    assert jnp.allclose(out2, ref2, atol=5e-3, rtol=1e-4), (out2, ref2)

    # bf16-streamed x (v6e/v7x bandwidth option): halves streamed bytes again.
    out3 = jax.block_until_ready(
        pc_log_score(x2, mu, log_sigma, logits, stream_dtype=jnp.bfloat16))
    assert out3.shape == (B2, 1)
    assert jnp.allclose(out3, ref2, atol=1.0, rtol=5e-2), (out3, ref2)

    print("KERNEL_OK")
</pallas_src>

<mosaic_0001>
module attributes {stable_mosaic.version = 11 : i64} {
  func.func @_pc_log_score_kernel(%arg0: i32, %arg1: memref<8x64xf32, #tpu.memory_space<vmem>>, %arg2: memref<64x128xf32, #tpu.memory_space<vmem>>, %arg3: memref<64x128xf32, #tpu.memory_space<vmem>>, %arg4: memref<1x128xf32, #tpu.memory_space<vmem>>, %arg5: memref<8x1xf32, #tpu.memory_space<vmem>>) attributes {dimension_semantics = [#tpu.dimension_semantics<parallel>], iteration_bounds = array<i64: 1>, scalar_prefetch = 0 : i64, scratch_operands = 0 : i64, tpu.core_type = #tpu.core_type<tc>, window_params = [{transform_indices = @transform_0, window_bounds = array<i64: 8, 64>}, {pipeline_mode = #tpu.pipeline_mode<synchronous>, transform_indices = @transform_1, window_bounds = array<i64: 64, 128>}, {pipeline_mode = #tpu.pipeline_mode<synchronous>, transform_indices = @transform_2, window_bounds = array<i64: 64, 128>}, {pipeline_mode = #tpu.pipeline_mode<synchronous>, transform_indices = @transform_3, window_bounds = array<i64: 1, 128>}, {transform_indices = @transform_4, window_bounds = array<i64: 8, 1>}]} {
    %c0 = arith.constant 0 : index
    %c0_0 = arith.constant 0 : index
    %0 = vector.load %arg1[%c0, %c0_0] : memref<8x64xf32, #tpu.memory_space<vmem>>, vector<8x64xf32>
    %1 = arith.mulf %0, %0 : vector<8x64xf32>
    %c0_1 = arith.constant 0 : index
    %c0_2 = arith.constant 0 : index
    %2 = vector.load %arg2[%c0_1, %c0_2] : memref<64x128xf32, #tpu.memory_space<vmem>>, vector<64x128xf32>
    %cst = arith.constant dense<0.000000e+00> : vector<8x128xf32>
    %3 = tpu.matmul %1, %2, %cst {dimension_numbers = #tpu.dot_dimension_numbers<[1], [0], [0], [1], [0, 0, 1, 1], [], []>} : vector<8x64xf32>, vector<64x128xf32>, vector<8x128xf32> -> vector<8x128xf32>
    %c0_3 = arith.constant 0 : index
    %c0_4 = arith.constant 0 : index
    %4 = vector.load %arg3[%c0_3, %c0_4] : memref<64x128xf32, #tpu.memory_space<vmem>>, vector<64x128xf32>
    %cst_5 = arith.constant dense<0.000000e+00> : vector<8x128xf32>
    %5 = tpu.matmul %0, %4, %cst_5 {dimension_numbers = #tpu.dot_dimension_numbers<[1], [0], [0], [1], [0, 0, 1, 1], [], []>} : vector<8x64xf32>, vector<64x128xf32>, vector<8x128xf32> -> vector<8x128xf32>
    %6 = arith.addf %3, %5 : vector<8x128xf32>
    %c0_6 = arith.constant 0 : index
    %c0_7 = arith.constant 0 : index
    %7 = vector.load %arg4[%c0_6, %c0_7] : memref<1x128xf32, #tpu.memory_space<vmem>>, vector<1x128xf32>
    %8 = vector.broadcast %7 : vector<1x128xf32> to vector<8x128xf32>
    %9 = arith.addf %6, %8 : vector<8x128xf32>
    %cst_8 = arith.constant dense<0xFF800000> : vector<8xf32>
    %10 = vector.multi_reduction <maximumf>, %9, %cst_8 [1] : vector<8x128xf32> to vector<8xf32>
    %11 = vector.shape_cast %10 : vector<8xf32> to vector<8x1xf32>
    %12 = vector.broadcast %11 : vector<8x1xf32> to vector<8x128xf32>
    %13 = arith.subf %9, %12 : vector<8x128xf32>
    %14 = math.exp %13 : vector<8x128xf32>
    %cst_9 = arith.constant dense<0.000000e+00> : vector<8xf32>
    %15 = vector.multi_reduction <add>, %14, %cst_9 [1] : vector<8x128xf32> to vector<8xf32>
    %16 = vector.shape_cast %15 : vector<8xf32> to vector<8x1xf32>
    %17 = math.log %16 : vector<8x1xf32>
    %18 = arith.addf %11, %17 : vector<8x1xf32>
    %c0_10 = arith.constant 0 : index
    %c0_11 = arith.constant 0 : index
    %19 = vector.load %arg5[%c0_10, %c0_11] : memref<8x1xf32, #tpu.memory_space<vmem>>, vector<8x1xf32>
    tpu.vector_store %arg5[%c0_10, %c0_11], %18 {strides = array<i32>} : memref<8x1xf32, #tpu.memory_space<vmem>>, vector<8x1xf32>,
    return
  }
  func.func @transform_0(%arg0: i32) -> (i32, i32) {
    %c0_i32 = arith.constant 0 : i32
    %c0_i32_0 = arith.constant 0 : i32
    return %arg0, %c0_i32 : i32, i32
  }
  func.func @transform_1(%arg0: i32) -> (i32, i32) {
    %c0_i32 = arith.constant 0 : i32
    %c0_i32_0 = arith.constant 0 : i32
    %c0_i32_1 = arith.constant 0 : i32
    return %c0_i32, %c0_i32_0 : i32, i32
  }
  func.func @transform_2(%arg0: i32) -> (i32, i32) {
    %c0_i32 = arith.constant 0 : i32
    %c0_i32_0 = arith.constant 0 : i32
    %c0_i32_1 = arith.constant 0 : i32
    return %c0_i32, %c0_i32_0 : i32, i32
  }
  func.func @transform_3(%arg0: i32) -> (i32, i32) {
    %c0_i32 = arith.constant 0 : i32
    %c0_i32_0 = arith.constant 0 : i32
    %c0_i32_1 = arith.constant 0 : i32
    return %c0_i32, %c0_i32_0 : i32, i32
  }
  func.func @transform_4(%arg0: i32) -> (i32, i32) {
    %c0_i32 = arith.constant 0 : i32
    %c0_i32_0 = arith.constant 0 : i32
    return %arg0, %c0_i32 : i32, i32
  }
}

</mosaic_0001>

<bundles_post_ra>
// kernel: tpu_custom_call.1
= control target key start
LH: loop header
LB: loop body
LE: loop exit
PB: predicated region body
PF: predicated region fallthrough
CT: control target
= control target key end

     0   :  { %9 = vsyncpa [#allocation3], 0  ;;  %s493_s0 = inlined_call_operand.hbm [shape: f32[8,64], index: 0, kind: input, shape index: {}]   ;;  %s494_s1 = inlined_call_operand.hbm [shape: f32[64,128], index: 1, kind: input, shape index: {}]   ;;  %s495_s2 = inlined_call_operand.hbm [shape: f32[64,128], index: 2, kind: input, shape index: {}]   ;;  %s496_s3 = inlined_call_operand.vmem [shape: f32[1,128], index: 3, kind: input, shape index: {}]   ;;  %s497_s4 = inlined_call_operand.vmem [shape: f32[8,1], index: 4, kind: output, shape index: {}]  }
   0x1   :  { %10 = vsyncpa [#allocation5], 0  ;;  %s412_s15 = smov [#allocation4]   ;;  %s342_s19 = scalar_lea.hbm %s494_s1, 1024 }
   0x2   :  { %s26_s16 = sshll.u32 %s412_s15, 4  ;;  %p343_p0 = scmp.ne.s32.totalorder %s494_s1, %s342_s19  ;;  %s27_s16 = int_to_ptr.vmem [resolvable:$true] %s26_s16 }
   0x3   :  { %p346_p1 = scmp.lt.u32.totalorder %s342_s19, %s494_s1 }
   0x5   :  { %p348_p2 = pnand %p346_p1, %p343_p0 }
   0x7   :  { %351 = shalt.err (!%p348_p2)
}
   0x8   :  { %s352_s24 = scalar_lea.vmem %s27_s16, 1024  ;;  %p357_p4 = scmp.lt.s32.totalorder %s27_s16, %s27_s16 }
   0x9   :  { %p353_p3 = scmp.ne.s32.totalorder %s27_s16, %s352_s24  ;;  %p358_p5 = scmp.lt.s32.totalorder %s352_s24, %s352_s24 }
   0xb   :  { %p359_p6 = por %p358_p5, %p357_p4 }
   0xd   :  { %p360_p7 = pnand %p359_p6, %p353_p3 }
   0xf   :  { %363 = shalt.err (!%p360_p7)
}
  0x10   :  { %s413_s25 = smov 128   ;;  %s414_s26 = smov 8  }
  0x11   :  { %32 = dma.hbm_to_vmem [thread:$0]  %s494_s1, 1024, %s27_s16, [#allocation5], %s413_s25, %s413_s25, %s414_s26  }
  0x12   :  { %s415_s29 = smov [#allocation2]   ;;  %s416_s5 = smov [#allocation6]  }
  0x13   :  { %s17_s30 = sshll.u32 %s415_s29, 4  ;;  %s38_s6 = sshll.u32 %s416_s5, 4  ;;  %s18_s30 = int_to_ptr.vmem [resolvable:$true] %s17_s30  ;;  %s39_s6 = int_to_ptr.vmem [resolvable:$true] %s38_s6 }
  0x14   :  { %s364_s9 = scalar_lea.hbm %s493_s0, 128 }
  0x15   :  { %p365_p8 = scmp.ne.s32.totalorder %s493_s0, %s364_s9  ;;  %p368_p9 = scmp.lt.u32.totalorder %s364_s9, %s493_s0 }
  0x17   :  { %p370_p10 = pnand %p368_p9, %p365_p8 }
  0x19   :  { %373 = shalt.err (!%p370_p10)
}
  0x1a   :  { %s374_s1 = scalar_lea.vmem %s18_s30, 128  ;;  %p379_p12 = scmp.lt.s32.totalorder %s18_s30, %s18_s30 }
  0x1b   :  { %p375_p11 = scmp.ne.s32.totalorder %s18_s30, %s374_s1  ;;  %p380_p13 = scmp.lt.s32.totalorder %s374_s1, %s374_s1 }
  0x1d   :  { %p381_p0 = por %p380_p13, %p379_p12 }
  0x1f   :  { %p382_p1 = pnand %p381_p0, %p375_p11 }
  0x21   :  { %385 = shalt.err (!%p382_p1)
}
  0x22   :  { %20 = dma.hbm_to_vmem [thread:$0]  %s493_s0, 128, %s18_s30, [#allocation3]  }
  0x23   :  { %s386_s18 = scalar_lea.hbm %s495_s2, 1024 }
  0x24   :  { %p387_p2 = scmp.ne.s32.totalorder %s495_s2, %s386_s18  ;;  %p390_p3 = scmp.lt.u32.totalorder %s386_s18, %s495_s2 }
  0x26   :  { %p392_p4 = pnand %p390_p3, %p387_p2 }
  0x28   :  { %395 = shalt.err (!%p392_p4)
}
  0x29   :  { %s396_s23 = scalar_lea.vmem %s39_s6, 1024  ;;  %p401_p6 = scmp.lt.s32.totalorder %s39_s6, %s39_s6 }
  0x2a   :  { %p397_p5 = scmp.ne.s32.totalorder %s39_s6, %s396_s23  ;;  %p402_p7 = scmp.lt.s32.totalorder %s396_s23, %s396_s23 }
  0x2c   :  { %p403_p8 = por %p402_p7, %p401_p6 }
  0x2e   :  { %p404_p9 = pnand %p403_p8, %p397_p5 }
  0x30   :  { %407 = shalt.err (!%p404_p9)
}
  0x31   :  { %44 = dma.hbm_to_vmem [thread:$0]  %s495_s2, 1024, %s39_s6, [#allocation5], %s413_s25, %s413_s25, %s414_s26  }
  0x32   :  { %408 = dma.done.wait [#allocation3], 128  }
  0x33   :  { %409 = vsyncadd [#allocation3], 4294967168 }
  0x34   :  { %410 = dma.done.wait [#allocation5], 2048  }
  0x35   :  { %411 = vsyncadd [#allocation5], 4294965248  ;;  %v417_v0 = vmov 0.0|0.0   ;;  %vm418_vm0 = vmmov 0   ;;  %v419_v1 = vmov 0.0   ;;  %v66_v2 = vld [vmem:[#allocation6] sm:$0xff] }
  0x36   :  { %306 = vmatprep.subr.bf16.mxu0 %v417_v0  ;;  %318 = vmatprep.subr.bf16.mxu1 %v417_v0  ;;  %v67_v3 = vld [vmem:[#allocation6 + $0x8] sm:$0xff]  ;;  %v58_v4 = vld [vmem:[#allocation4] sm:$0xff]  ;;  %v68_v7 = vld [vmem:[#allocation6 + $0x10] sm:$0xff]  ;;  %vm74_vm1 = vcmask 523264   ;;  %vm239_vm2 = vcmask 7168  }
  0x37   :  { %284 = vmatprep.mubr.msk.f32.mxu0 %vm418_vm0, %v419_v1  ;;  %303 = vmatprep.mubr.msk.f32.mxu1 %vm418_vm0, %v419_v1  ;;  %v307_v5 = vpack.c.bf16 %v67_v3, %v66_v2  ;;  %v59_v6 = vld [vmem:[#allocation4 + $0x8] sm:$0xff]  ;;  %v69_v8 = vld [vmem:[#allocation6 + $0x18] sm:$0xff]  ;;  %v60_v10 = vld [vmem:[#allocation4 + $0x10] sm:$0xff] }
  0x38   :  { %v319_v9 = vpack.c.bf16 %v59_v6, %v58_v4  ;;  %v61_v11 = vld [vmem:[#allocation4 + $0x18] sm:$0xff]  ;;  %v310_v12 = vpack.c.bf16 %v69_v8, %v68_v7  ;;  %v70_v14 = vld [vmem:[#allocation6 + $0x20] sm:$0xff]  ;;  %v71_v15 = vld [vmem:[#allocation6 + $0x28] sm:$0xff] }
  0x39   :  { %308 = vmatpush3.bf16.msra.mxu0 %v307_v5  ;;  %v322_v13 = vpack.c.bf16 %v61_v11, %v60_v10  ;;  %v62_v16 = vld [vmem:[#allocation4 + $0x20] sm:$0xff]  ;;  %v63_v17 = vld [vmem:[#allocation4 + $0x28] sm:$0xff]  ;;  %v313_v18 = vpack.c.bf16 %v71_v15, %v70_v14  ;;  %v72_v20 = vld [vmem:[#allocation6 + $0x30] sm:$0xff] }
  0x3a   :  { %320 = vmatpush3.bf16.msra.mxu1 %v319_v9  ;;  %309 = vmatprep.subr.bf16.mxu0 %v417_v0  ;;  %v325_v19 = vpack.c.bf16 %v63_v17, %v62_v16  ;;  %v73_v21 = vld [vmem:[#allocation6 + $0x38] sm:$0xff]  ;;  %v64_v22 = vld [vmem:[#allocation4 + $0x30] sm:$0xff] }
  0x3b   :  { %321 = vmatprep.subr.bf16.mxu1 %v417_v0  ;;  %v65_v23 = vld [vmem:[#allocation4 + $0x38] sm:$0xff]  ;;  %v316_v24 = vpack.c.bf16 %v73_v21, %v72_v20  ;;  %v249_v31 = vld [vmem:[%s496_s3] ss:$0 sm:$0xff] }
  0x3c   :  { %v328_v25 = vpack.c.bf16 %v65_v23, %v64_v22  ;;  %v56_v26 = vld [vmem:[#allocation2] sm:$0xff] }
  0x3d   :  { %311 = vmatpush3.bf16.msra.mxu0 %v310_v12  ;;  %v57_v27 = vmul.f32 %v56_v26, %v56_v26 }
  0x3e   :  { %323 = vmatpush3.bf16.msra.mxu1 %v322_v13  ;;  %312 = vmatprep.subr.bf16.mxu0 %v417_v0 }
  0x3f   :  { %324 = vmatprep.subr.bf16.mxu1 %v417_v0 }
  0x41   :  { %314 = vmatpush3.bf16.msra.mxu0 %v313_v18 }
  0x42   :  { %326 = vmatpush3.bf16.msra.mxu1 %v325_v19  ;;  %315 = vmatprep.subr.bf16.mxu0 %v417_v0 }
  0x43   :  { %327 = vmatprep.subr.bf16.mxu1 %v417_v0 }
  0x45   :  { %317 = vmatpush3.bf16.msra.mxu0 %v316_v24 }
  0x46   :  { %329 = vmatpush3.bf16.msra.mxu1 %v328_v25 }
  0x48   :  { %285 = vmatmul.mubr.msk.f32.vlgmr.msra.gmra.mrb[0].mxu0 %vm74_vm1, %v56_v26 }
  0x49   :  { %304 = vmatmul.mubr.msk.f32.vlgmr.msra.gmra.mrb[0].mxu1 %vm74_vm1, %v57_v27 }
 0x11b   :  { %v144_v28 = vpop.f32.mrb[0].mxu0 }
 0x11c   :  { %v217_v29 = vpop.f32.mrb[0].mxu1  ;;  %v286_v30 = vpop.f32.mrb[1].mxu0 }
 0x11d   :  { %v218_v32 = vadd.f32 %v217_v29, %v144_v28  ;;  %v305_v33 = vpop.f32.mrb[1].mxu1 }
 0x11f   :  { %v228_v34 = vadd.f32 %v249_v31, %v218_v32 }
 0x121   :  { %229 = vmax.xlane.f32.xlu0 %v228_v34 }
 0x1ae   :  { %v230_v35 = vpop.xlane.xlu0 %229 }
 0x1af   :  { %v231_v36 = vsub.f32 %v228_v34, %v230_v35 }
 0x1b1   :  { %v232_v37 = vmul.f32 1.442695, %v231_v36 }
 0x1b3   :  { %338 = vpow2.f32 %v232_v37 }
 0x1bd   :  { %v339_v38 = vpop.eup %338 }
 0x1be   :  { %234 = vadd.xlane.f32.xlu0 %v339_v38 }
 0x24b   :  { %v235_v39 = vpop.xlane.xlu0 %234 }
 0x24c   :  { %340 = vlog2.f32 %v235_v39 }
 0x256   :  { %v341_v40 = vpop.eup %340 }
 0x257   :  { %v237_v41 = vmul.f32 0.6931472, %v341_v40 }
 0x259   :  { %v238_v42 = vadd.f32 %v237_v41, %v230_v35 }
 0x25b   :  { %240 = vst.msk [vmem:[%s497_s4] sm:$0xff] %vm239_vm2, %v238_v42 }
 0x25c   :  { %245 = vsyncpa [#allocation3], 1 }
 0x25d   :  { %246 = vsyncpa [#allocation5], 1 }

</bundles_post_ra>
